<compile_context>
chip_gen: v7x
topology: tpu7x:2x2x1
jax: 0.10.0
libtpu: 0.0.40
codegen_flags: <defaults>
</compile_context>

<pallas_src>
import functools
import math

import jax
import jax.numpy as jnp
import numpy as np
from jax.experimental import pallas as pl
from jax.experimental.pallas import tpu as pltpu

NEG = -1000000000000.0  # '-inf' surrogate used by the PyTorch module


def _egp_kernel(mpos_ref, mrow_ref, mcol_ref, x_ref,
                w1t_ref, b1_ref, w2e_ref, b2e_ref, w2ot_ref, b2o_ref,
                cos2_ref, sin2_ref,
                out_ref,
                qw_scr, kw_scr, bk_scr, bq_scr,
                *, heads, head_size, block_q):
    hd = head_size
    tq = block_q
    qi = pl.program_id(1)
    q0 = pl.multiple_of(qi * tq, tq)            # global query offset of this tile

    # ---------- once per batch element (hoisted; qi axis is "arbitrary") ----
    @pl.when(qi == 0)
    def _():
        x = x_ref[0]                                              # (N, H)
        # Fused linear_1; weight columns pre-permuted host-side so the result
        # is [ q | k | rot_half(q) | rot_half(k) ]. HIGHEST is affordable now
        # that this runs once per batch element.
        h_all = jnp.dot(x, w1t_ref[...],
                        precision=jax.lax.Precision.HIGHEST,
                        preferred_element_type=jnp.float32) + b1_ref[...]  # (N, 4hd)
        h_qk = h_all[:, :2 * hd]                                  # pre-RoPE [q | k]

        # RoPE on a lane-aligned (N, 2hd) slab. 1/sqrt(hd) is folded into the
        # q half of cos2/sin2; the rotate-half sign is folded into sin2.
        qk = h_qk * cos2_ref[...] + h_all[:, 2 * hd:] * sin2_ref[...]
        qk = qk * mpos_ref[0]                    # zero masked rows of q and k
        qw_scr[...] = qk[:, :hd].astype(jnp.bfloat16)
        kw_scr[...] = qk[:, hd:].astype(jnp.bfloat16)

        # linear_2 biases (applied to pre-RoPE h): even rows -> key-side bias
        # (heads, N), odd rows -> query-side bias (N, heads).
        bk_scr[...] = (jax.lax.dot_general(
            w2e_ref[...], h_qk, (((1,), (1,)), ((), ())),
            precision=jax.lax.Precision.HIGHEST,
            preferred_element_type=jnp.float32) + b2e_ref[...]) * 0.5
        bq_scr[...] = (jnp.dot(h_qk, w2ot_ref[...],
                               precision=jax.lax.Precision.HIGHEST,
                               preferred_element_type=jnp.float32)
                       + b2o_ref[...]) * 0.5

    # ---------- per query tile ----------------------------------------------
    q_t = qw_scr[pl.ds(q0, tq), :]                                # (tq, hd) bf16
    # Dominant matmul: single-pass bf16 on the MXU, f32 accumulation.
    logits = jax.lax.dot_general(
        q_t, kw_scr[...], (((1,), (1,)), ((), ())),
        preferred_element_type=jnp.float32)                       # (tq, N) f32

    m_row = mrow_ref[0]                                           # (tq, 1)
    m_col = mcol_ref[0]                                           # (1, N)
    n = m_col.shape[-1]
    keep = m_row * m_col                                          # (tq, N)
    ri = q0 + jax.lax.broadcasted_iota(jnp.int32, (tq, n), 0)
    ci = jax.lax.broadcasted_iota(jnp.int32, (tq, n), 1)
    tri = (ri > ci).astype(jnp.float32)                           # strict lower tri
    # Head-invariant base: masked logits + additive '-inf' surrogate.
    base = logits + NEG * ((1.0 - keep) + tri)                    # (tq, N)

    bq_t = bq_scr[pl.ds(q0, tq), :]                               # (tq, heads)
    for h in range(heads):                        # heads is small and static
        out_ref[0, h, :, :] = (base + bk_scr[h:h + 1, :]
                               + bq_t[:, h:h + 1]).astype(out_ref.dtype)


def _tpu_vmem_capacity():
    try:
        info = pltpu.get_tpu_info()
        return int(getattr(info, "vmem_capacity_bytes", 64 * 2**20))
    except Exception:
        return 64 * 2**20          # conservative fallback: v7x per-core VMEM


def _pick_block_q(N, vmem_cap):
    # 256 on 128-MiB-VMEM parts (v5e/v6e), 128 on v7x (64 MiB VMEM).
    prefs = (256, 128) if vmem_cap >= 96 * 2**20 else (128,)
    for bq in prefs:
        if N % bq == 0:
            return bq
    if N % 8 == 0:
        for bq in range(min(N, 256), 7, -8):      # largest divisor, multiple of 8
            if N % bq == 0:
                return bq
    # TODO(synk): pad N to a multiple of 128 upstream; block_q = N here means
    # sub-128-lane masked stores for ragged sequence lengths.
    return N


def efficient_global_pointer(x, mask, params, heads, head_size, *,
                             block_q=None, out_dtype=jnp.float32):
    """x: (B, N, hidden) f32, mask: (B, N) in {0,1} -> (B, heads, N, N)."""
    B, N, H = x.shape
    hd = head_size
    half = hd // 2
    W1 = jnp.asarray(params["W1"])
    b1 = jnp.asarray(params["b1"])
    W2 = jnp.asarray(params["W2"])
    b2 = jnp.asarray(params["b2"])

    vmem_cap = _tpu_vmem_capacity()
    if block_q is None:
        block_q = _pick_block_q(N, vmem_cap)
    assert N % block_q == 0, "sequence length must be divisible by block_q"
    n_q = N // block_q

    # linear_1 output columns taken by q (::2) / k (1::2), de-interleaved so
    # RoPE pairs sit as [first half | second half] (dot-product invariant),
    # plus rotate-half permutations -> fused layout [q | k | rot(q) | rot(k)].
    q_cols = np.concatenate([4 * np.arange(half), 4 * np.arange(half) + 2])
    k_cols = q_cols + 1
    q_rot_cols = np.concatenate([q_cols[half:], q_cols[:half]])
    k_rot_cols = np.concatenate([k_cols[half:], k_cols[:half]])
    row_perm = np.concatenate([q_cols, k_cols, q_rot_cols, k_rot_cols])
    qk_cols = np.concatenate([q_cols, k_cols])

    # Stationary weights pre-permuted AND pre-transposed (plain NN matmuls in
    # the kernel; no per-invocation relayout of the stationary operand).
    W1T = W1[row_perm, :].T                           # (H, 4*hd)
    b1cat = b1[row_perm].reshape(1, 4 * hd)
    W2e = W2[0::2][:, qk_cols]                        # (heads, 2*hd) key-side
    W2oT = W2[1::2][:, qk_cols].T                     # (2*hd, heads) query-side
    b2e = b2[0::2].reshape(heads, 1)
    b2o = b2[1::2].reshape(1, heads)

    # SinusoidalPositionEmbedding('zero') tables, rotate-half layout, width
    # 2*hd so RoPE is one fused op; 1/sqrt(hd) folded into the q half, the
    # rotate-half sign folded into sin.
    pos_n = np.arange(N, dtype=np.float32)[:, None]
    idx = np.arange(half, dtype=np.float32)[None, :]
    ang = pos_n * np.power(10000.0, -2.0 * idx / hd)               # (N, hd/2)
    cos_hd = np.concatenate([np.cos(ang), np.cos(ang)], -1)        # (N, hd)
    sin_hd = np.concatenate([-np.sin(ang), np.sin(ang)], -1)       # (N, hd)
    scale = 1.0 / math.sqrt(hd)
    cos2 = jnp.asarray(np.concatenate([cos_hd * scale, cos_hd], -1), jnp.float32)
    sin2 = jnp.asarray(np.concatenate([sin_hd * scale, sin_hd], -1), jnp.float32)

    maskf = mask.astype(jnp.float32)
    m_pos = maskf[:, :, None]                         # (B, N, 1) full-seq mask
    m_col = maskf[:, None, :]                         # (B, 1, N) key-axis mask

    def rep2(shape):                                  # replicated 2-D operand
        return pl.BlockSpec(shape, lambda b, qi: (0, 0))

    kernel = functools.partial(_egp_kernel, heads=heads, head_size=hd,
                               block_q=block_q)

    # Generation-aware VMEM budget: estimate the real footprint and cap at
    # 75% of physical VMEM (<= ~48 MiB on v7x). For very large N*heads reduce
    # block_q (or add a key-axis grid dim) rather than relying on this cap.
    def _rup(v, m):
        return ((v + m - 1) // m) * m
    lane = 128
    n_l = _rup(N, lane)
    out_blk = heads * block_q * n_l * 4
    est = (2 * out_blk                                   # output block (x2 bufs)
           + 2 * N * _rup(H, lane) * 4                   # x block (x2 bufs)
           + 4 * N * _rup(2 * hd, lane) * 4              # cos2/sin2 (x2 bufs)
           + 4 * _rup(H, 8) * _rup(4 * hd, lane) * 4     # W1T (x2 bufs)
           + 4 * N * _rup(4 * hd, lane) * 4              # hoist temporaries
           + 2 * N * _rup(hd, lane) * 2                  # qw/kw bf16 scratch
           + _rup(heads, 8) * n_l * 4 + N * lane * 4     # bias scratches
           + 6 * block_q * n_l * 4                       # per-tile temporaries
           + (1 << 20))                                  # small operands + slack
    vmem_limit = int(max(32 * 2**20, min(int(0.75 * vmem_cap), int(1.5 * est))))

    # NOTE (megacore): the scratch-carried hoist requires the query-tile axis
    # to be "arbitrary"; the batch axis stays "parallel" so v7x's two cores
    # split the batch. For B == 1 a two-call split would keep both cores busy.
    return pl.pallas_call(
        kernel,
        out_shape=jax.ShapeDtypeStruct((B, heads, N, N), out_dtype),
        grid=(B, n_q),
        in_specs=[
            pl.BlockSpec((1, N, 1), lambda b, qi: (b, 0, 0)),          # mask (full)
            pl.BlockSpec((1, block_q, 1), lambda b, qi: (b, qi, 0)),   # mask (tile)
            pl.BlockSpec((1, 1, N), lambda b, qi: (b, 0, 0)),          # mask (cols)
            pl.BlockSpec((1, N, H), lambda b, qi: (b, 0, 0)),          # x (full seq)
            rep2((H, 4 * hd)), rep2((1, 4 * hd)),                      # W1T, b1
            rep2((heads, 2 * hd)), rep2((heads, 1)),                   # W2e, b2e
            rep2((2 * hd, heads)), rep2((1, heads)),                   # W2oT, b2o
            rep2((N, 2 * hd)), rep2((N, 2 * hd)),                      # cos2, sin2
        ],
        out_specs=pl.BlockSpec((1, heads, block_q, N),
                               lambda b, qi: (b, 0, qi, 0)),
        scratch_shapes=[
            pltpu.VMEM((N, hd), jnp.bfloat16),        # RoPE'd, scaled, masked q
            pltpu.VMEM((N, hd), jnp.bfloat16),        # RoPE'd, masked k
            pltpu.VMEM((heads, N), jnp.float32),      # key-side bias
            pltpu.VMEM((N, heads), jnp.float32),      # query-side bias
        ],
        compiler_params=pltpu.CompilerParams(
            dimension_semantics=("parallel", "arbitrary"),
            vmem_limit_bytes=vmem_limit),
    )(m_pos, m_pos, m_col, x, W1T, b1cat, W2e, b2e, W2oT, b2o, cos2, sin2)


def reference_forward(x, mask, W1, b1, W2, b2, heads, hd):
    """Direct jnp transcription of the PyTorch forward (for verification)."""
    B, N, H = x.shape
    h = jnp.einsum('bnh,dh->bnd', x, W1) + b1                 # linear_1
    qw, kw = h[..., 0::2], h[..., 1::2]
    pos_n = jnp.arange(N, dtype=jnp.float32)[:, None]
    idx = jnp.arange(hd // 2, dtype=jnp.float32)[None, :]
    ang = pos_n * jnp.power(10000.0, -2.0 * idx / hd)
    pos = jnp.stack([jnp.sin(ang), jnp.cos(ang)], axis=-1).reshape(1, N, hd)
    cos_pos = jnp.repeat(pos[..., 1::2], 2, axis=-1)
    sin_pos = jnp.repeat(pos[..., 0::2], 2, axis=-1)
    qw2 = jnp.stack([-qw[..., 1::2], qw[..., 0::2]], axis=3).reshape(qw.shape)
    kw2 = jnp.stack([-kw[..., 1::2], kw[..., 0::2]], axis=3).reshape(kw.shape)
    qw = qw * cos_pos + qw2 * sin_pos
    kw = kw * cos_pos + kw2 * sin_pos
    logits = jnp.einsum('bmd,bnd->bmn', qw, kw) / (hd ** 0.5)
    bias = jnp.einsum('bnh->bhn', jnp.einsum('bnd,hd->bnh', h, W2) + b2) / 2
    logits = logits[:, None] + bias[:, 0::2, None] + bias[:, 1::2, :, None]
    m = mask.astype(logits.dtype)
    mr = m[:, None, :, None]
    mc = m[:, None, None, :]
    logits = logits * mr + NEG * (1 - mr)
    logits = logits * mc + NEG * (1 - mc)
    tri = jnp.tril(jnp.ones_like(logits), k=-1)
    return logits - tri * 1000000000000.0


if __name__ == "__main__":
    B, N, H = 2, 8, 32
    heads, head_size = 4, 16

    key = jax.random.PRNGKey(0)
    kx, k1, k2, k3, k4 = jax.random.split(key, 5)
    x = jax.random.normal(kx, (B, N, H), dtype=jnp.float32)
    W1 = jax.random.normal(k1, (2 * head_size, H), jnp.float32) / math.sqrt(H)
    b1 = 0.1 * jax.random.normal(k2, (2 * head_size,), jnp.float32)
    W2 = jax.random.normal(k3, (2 * heads, 2 * head_size), jnp.float32) / math.sqrt(2 * head_size)
    b2 = 0.1 * jax.random.normal(k4, (2 * heads,), jnp.float32)
    mask = jnp.array([[1, 1, 1, 1, 1, 1, 0, 0],
                      [1, 1, 1, 1, 0, 0, 0, 0]], dtype=jnp.float32)

    params = dict(W1=W1, b1=b1, W2=W2, b2=b2)
    out = jax.block_until_ready(
        efficient_global_pointer(x, mask, params, heads, head_size))

    with jax.default_matmul_precision("highest"):
        ref = jax.block_until_ready(
            reference_forward(x, mask, W1, b1, W2, b2, heads, head_size))

    out_np = np.asarray(out)
    ref_np = np.asarray(ref)
    m_np = np.asarray(mask)
    keep = (m_np[:, None, :, None] * m_np[:, None, None, :]) > 0.5
    keep = np.broadcast_to(keep, out_np.shape)
    rows = np.arange(N)[:, None]
    cols = np.arange(N)[None, :]
    upper = np.broadcast_to(rows <= cols, out_np.shape)
    live = keep & upper
    # Unmasked, non-tril entries: tight check (only bf16 score-matmul error).
    np.testing.assert_allclose(out_np[live], ref_np[live], rtol=3e-2, atol=3e-2)
    # Masked / tril entries are '-inf' surrogates in both implementations
    # (kernel may differ from reference by an O(1) unmasked bias term there).
    assert np.all(out_np[~live] <= -9.0e11), "masked entries not suppressed (kernel)"
    assert np.all(ref_np[~live] <= -9.0e11), "masked entries not suppressed (reference)"
    print("KERNEL_OK")
</pallas_src>

<mosaic_0001>
module attributes {stable_mosaic.version = 11 : i64} {
  func.func @_egp_kernel(%arg0: i32, %arg1: i32, %arg2: memref<1x8x1xf32, #tpu.memory_space<vmem>>, %arg3: memref<1x8x1xf32, #tpu.memory_space<vmem>>, %arg4: memref<1x1x8xf32, #tpu.memory_space<vmem>>, %arg5: memref<1x8x32xf32, #tpu.memory_space<vmem>>, %arg6: memref<32x64xf32, #tpu.memory_space<vmem>>, %arg7: memref<1x64xf32, #tpu.memory_space<vmem>>, %arg8: memref<4x32xf32, #tpu.memory_space<vmem>>, %arg9: memref<4x1xf32, #tpu.memory_space<vmem>>, %arg10: memref<32x4xf32, #tpu.memory_space<vmem>>, %arg11: memref<1x4xf32, #tpu.memory_space<vmem>>, %arg12: memref<8x32xf32, #tpu.memory_space<vmem>>, %arg13: memref<8x32xf32, #tpu.memory_space<vmem>>, %arg14: memref<1x4x8x8xf32, #tpu.memory_space<vmem>>, %arg15: memref<8x16xbf16, #tpu.memory_space<vmem>>, %arg16: memref<8x16xbf16, #tpu.memory_space<vmem>>, %arg17: memref<4x8xf32, #tpu.memory_space<vmem>>, %arg18: memref<8x4xf32, #tpu.memory_space<vmem>>) attributes {dimension_semantics = [#tpu.dimension_semantics<parallel>, #tpu.dimension_semantics<arbitrary>], iteration_bounds = array<i64: 2, 1>, scalar_prefetch = 0 : i64, scratch_operands = 4 : i64, tpu.core_type = #tpu.core_type<tc>, window_params = [{transform_indices = @transform_0, window_bounds = array<i64: 1, 8, 1>}, {transform_indices = @transform_1, window_bounds = array<i64: 1, 8, 1>}, {transform_indices = @transform_2, window_bounds = array<i64: 1, 1, 8>}, {transform_indices = @transform_3, window_bounds = array<i64: 1, 8, 32>}, {pipeline_mode = #tpu.pipeline_mode<synchronous>, transform_indices = @transform_4, window_bounds = array<i64: 32, 64>}, {pipeline_mode = #tpu.pipeline_mode<synchronous>, transform_indices = @transform_5, window_bounds = array<i64: 1, 64>}, {pipeline_mode = #tpu.pipeline_mode<synchronous>, transform_indices = @transform_6, window_bounds = array<i64: 4, 32>}, {pipeline_mode = #tpu.pipeline_mode<synchronous>, transform_indices = @transform_7, window_bounds = array<i64: 4, 1>}, {pipeline_mode = #tpu.pipeline_mode<synchronous>, transform_indices = @transform_8, window_bounds = array<i64: 32, 4>}, {pipeline_mode = #tpu.pipeline_mode<synchronous>, transform_indices = @transform_9, window_bounds = array<i64: 1, 4>}, {pipeline_mode = #tpu.pipeline_mode<synchronous>, transform_indices = @transform_10, window_bounds = array<i64: 8, 32>}, {pipeline_mode = #tpu.pipeline_mode<synchronous>, transform_indices = @transform_11, window_bounds = array<i64: 8, 32>}, {transform_indices = @transform_12, window_bounds = array<i64: 1, 4, 8, 8>}]} {
    %c8_i32 = arith.constant 8 : i32
    %0 = arith.muli %arg1, %c8_i32 : i32
    %1 = tpu.assume_multiple %0, 8 : i32
    %c0_i32 = arith.constant 0 : i32
    %2 = arith.cmpi eq, %arg1, %c0_i32 : i32
    %3 = arith.extui %2 : i1 to i32
    %c0_i32_0 = arith.constant 0 : i32
    %4 = arith.cmpi ne, %3, %c0_i32_0 : i32
    scf.if %4 {
      %c0_33 = arith.constant 0 : index
      %c0_34 = arith.constant 0 : index
      %c0_35 = arith.constant 0 : index
      %67 = vector.load %arg5[%c0_33, %c0_34, %c0_35] : memref<1x8x32xf32, #tpu.memory_space<vmem>>, vector<1x8x32xf32>
      %68 = vector.shape_cast %67 : vector<1x8x32xf32> to vector<8x32xf32>
      %c0_36 = arith.constant 0 : index
      %c0_37 = arith.constant 0 : index
      %69 = vector.load %arg6[%c0_36, %c0_37] : memref<32x64xf32, #tpu.memory_space<vmem>>, vector<32x64xf32>
      %cst_38 = arith.constant dense<0.000000e+00> : vector<8x64xf32>
      %70 = tpu.matmul %68, %69, %cst_38 {dimension_numbers = #tpu.dot_dimension_numbers<[1], [0], [0], [1], [0, 0, 1, 1], [], []>, precision = #tpu.contract_precision<fp32>} : vector<8x32xf32>, vector<32x64xf32>, vector<8x64xf32> -> vector<8x64xf32>
      %c0_39 = arith.constant 0 : index
      %c0_40 = arith.constant 0 : index
      %71 = vector.load %arg7[%c0_39, %c0_40] : memref<1x64xf32, #tpu.memory_space<vmem>>, vector<1x64xf32>
      %72 = vector.broadcast %71 : vector<1x64xf32> to vector<8x64xf32>
      %73 = arith.addf %70, %72 : vector<8x64xf32>
      %74 = vector.extract_strided_slice %73 {offsets = [0, 0], sizes = [8, 32], strides = [1, 1]} : vector<8x64xf32> to vector<8x32xf32>
      %c0_41 = arith.constant 0 : index
      %c0_42 = arith.constant 0 : index
      %75 = vector.load %arg12[%c0_41, %c0_42] : memref<8x32xf32, #tpu.memory_space<vmem>>, vector<8x32xf32>
      %76 = arith.mulf %74, %75 : vector<8x32xf32>
      %77 = vector.extract_strided_slice %73 {offsets = [0, 32], sizes = [8, 32], strides = [1, 1]} : vector<8x64xf32> to vector<8x32xf32>
      %c0_43 = arith.constant 0 : index
      %c0_44 = arith.constant 0 : index
      %78 = vector.load %arg13[%c0_43, %c0_44] : memref<8x32xf32, #tpu.memory_space<vmem>>, vector<8x32xf32>
      %79 = arith.mulf %77, %78 : vector<8x32xf32>
      %80 = arith.addf %76, %79 : vector<8x32xf32>
      %c0_45 = arith.constant 0 : index
      %c0_46 = arith.constant 0 : index
      %c0_47 = arith.constant 0 : index
      %81 = vector.load %arg2[%c0_45, %c0_46, %c0_47] : memref<1x8x1xf32, #tpu.memory_space<vmem>>, vector<1x8x1xf32>
      %82 = vector.shape_cast %81 : vector<1x8x1xf32> to vector<8x1xf32>
      %83 = vector.broadcast %82 : vector<8x1xf32> to vector<8x32xf32>
      %84 = arith.mulf %80, %83 : vector<8x32xf32>
      %85 = vector.extract_strided_slice %84 {offsets = [0, 0], sizes = [8, 16], strides = [1, 1]} : vector<8x32xf32> to vector<8x16xf32>
      %86 = arith.truncf %85 : vector<8x16xf32> to vector<8x16xbf16>
      %c0_48 = arith.constant 0 : index
      %c0_49 = arith.constant 0 : index
      %87 = vector.load %arg15[%c0_48, %c0_49] : memref<8x16xbf16, #tpu.memory_space<vmem>>, vector<8x16xbf16>
      tpu.vector_store %arg15[%c0_48, %c0_49], %86 {strides = array<i32>} : memref<8x16xbf16, #tpu.memory_space<vmem>>, vector<8x16xbf16>,
      %88 = vector.extract_strided_slice %84 {offsets = [0, 16], sizes = [8, 16], strides = [1, 1]} : vector<8x32xf32> to vector<8x16xf32>
      %89 = arith.truncf %88 : vector<8x16xf32> to vector<8x16xbf16>
      %c0_50 = arith.constant 0 : index
      %c0_51 = arith.constant 0 : index
      %90 = vector.load %arg16[%c0_50, %c0_51] : memref<8x16xbf16, #tpu.memory_space<vmem>>, vector<8x16xbf16>
      tpu.vector_store %arg16[%c0_50, %c0_51], %89 {strides = array<i32>} : memref<8x16xbf16, #tpu.memory_space<vmem>>, vector<8x16xbf16>,
      %c0_52 = arith.constant 0 : index
      %c0_53 = arith.constant 0 : index
      %91 = vector.load %arg8[%c0_52, %c0_53] : memref<4x32xf32, #tpu.memory_space<vmem>>, vector<4x32xf32>
      %cst_54 = arith.constant dense<0.000000e+00> : vector<4x8xf32>
      %92 = tpu.matmul %91, %74, %cst_54 {dimension_numbers = #tpu.dot_dimension_numbers<[1], [1], [0], [0], [0, 0, 1, 0], [], []>, precision = #tpu.contract_precision<fp32>} : vector<4x32xf32>, vector<8x32xf32>, vector<4x8xf32> -> vector<4x8xf32>
      %c0_55 = arith.constant 0 : index
      %c0_56 = arith.constant 0 : index
      %93 = vector.load %arg9[%c0_55, %c0_56] : memref<4x1xf32, #tpu.memory_space<vmem>>, vector<4x1xf32>
      %94 = vector.broadcast %93 : vector<4x1xf32> to vector<4x8xf32>
      %95 = arith.addf %92, %94 : vector<4x8xf32>
      %cst_57 = arith.constant 5.000000e-01 : f32
      %96 = vector.broadcast %cst_57 : f32 to vector<4x8xf32>
      %97 = arith.mulf %95, %96 : vector<4x8xf32>
      %c0_58 = arith.constant 0 : index
      %c0_59 = arith.constant 0 : index
      %98 = vector.load %arg17[%c0_58, %c0_59] : memref<4x8xf32, #tpu.memory_space<vmem>>, vector<4x8xf32>
      tpu.vector_store %arg17[%c0_58, %c0_59], %97 {strides = array<i32>} : memref<4x8xf32, #tpu.memory_space<vmem>>, vector<4x8xf32>,
      %c0_60 = arith.constant 0 : index
      %c0_61 = arith.constant 0 : index
      %99 = vector.load %arg10[%c0_60, %c0_61] : memref<32x4xf32, #tpu.memory_space<vmem>>, vector<32x4xf32>
      %cst_62 = arith.constant dense<0.000000e+00> : vector<8x4xf32>
      %100 = tpu.matmul %74, %99, %cst_62 {dimension_numbers = #tpu.dot_dimension_numbers<[1], [0], [0], [1], [0, 0, 1, 1], [], []>, precision = #tpu.contract_precision<fp32>} : vector<8x32xf32>, vector<32x4xf32>, vector<8x4xf32> -> vector<8x4xf32>
      %c0_63 = arith.constant 0 : index
      %c0_64 = arith.constant 0 : index
      %101 = vector.load %arg11[%c0_63, %c0_64] : memref<1x4xf32, #tpu.memory_space<vmem>>, vector<1x4xf32>
      %102 = vector.broadcast %101 : vector<1x4xf32> to vector<8x4xf32>
      %103 = arith.addf %100, %102 : vector<8x4xf32>
      %cst_65 = arith.constant 5.000000e-01 : f32
      %104 = vector.broadcast %cst_65 : f32 to vector<8x4xf32>
      %105 = arith.mulf %103, %104 : vector<8x4xf32>
      %c0_66 = arith.constant 0 : index
      %c0_67 = arith.constant 0 : index
      %106 = vector.load %arg18[%c0_66, %c0_67] : memref<8x4xf32, #tpu.memory_space<vmem>>, vector<8x4xf32>
      tpu.vector_store %arg18[%c0_66, %c0_67], %105 {strides = array<i32>} : memref<8x4xf32, #tpu.memory_space<vmem>>, vector<8x4xf32>,
    } else {
    }
    %5 = arith.index_cast %1 : i32 to index
    %c0 = arith.constant 0 : index
    %6 = vector.load %arg15[%5, %c0] : memref<8x16xbf16, #tpu.memory_space<vmem>>, vector<8x16xbf16>
    %c0_1 = arith.constant 0 : index
    %c0_2 = arith.constant 0 : index
    %7 = vector.load %arg16[%c0_1, %c0_2] : memref<8x16xbf16, #tpu.memory_space<vmem>>, vector<8x16xbf16>
    %cst = arith.constant dense<0.000000e+00> : vector<8x8xf32>
    %8 = tpu.matmul %6, %7, %cst {dimension_numbers = #tpu.dot_dimension_numbers<[1], [1], [0], [0], [0, 0, 1, 0], [], []>} : vector<8x16xbf16>, vector<8x16xbf16>, vector<8x8xf32> -> vector<8x8xf32>
    %c0_3 = arith.constant 0 : index
    %c0_4 = arith.constant 0 : index
    %c0_5 = arith.constant 0 : index
    %9 = vector.load %arg3[%c0_3, %c0_4, %c0_5] : memref<1x8x1xf32, #tpu.memory_space<vmem>>, vector<1x8x1xf32>
    %10 = vector.shape_cast %9 : vector<1x8x1xf32> to vector<8x1xf32>
    %c0_6 = arith.constant 0 : index
    %c0_7 = arith.constant 0 : index
    %c0_8 = arith.constant 0 : index
    %11 = vector.load %arg4[%c0_6, %c0_7, %c0_8] : memref<1x1x8xf32, #tpu.memory_space<vmem>>, vector<1x1x8xf32>
    %12 = vector.shape_cast %11 : vector<1x1x8xf32> to vector<1x8xf32>
    %13 = vector.broadcast %10 : vector<8x1xf32> to vector<8x8xf32>
    %14 = vector.broadcast %12 : vector<1x8xf32> to vector<8x8xf32>
    %15 = arith.mulf %13, %14 : vector<8x8xf32>
    %16 = tpu.iota {dimensions = array<i32: 0>} : vector<8x8xi32>
    %17 = vector.broadcast %1 : i32 to vector<8x8xi32>
    %18 = arith.addi %17, %16 : vector<8x8xi32>
    %19 = tpu.iota {dimensions = array<i32: 1>} : vector<8x8xi32>
    %20 = arith.cmpi sgt, %18, %19 : vector<8x8xi32>
    %21 = arith.extui %20 : vector<8x8xi1> to vector<8x8xi32>
    %22 = arith.sitofp %21 : vector<8x8xi32> to vector<8x8xf32>
    %cst_9 = arith.constant 1.000000e+00 : f32
    %23 = vector.broadcast %cst_9 : f32 to vector<8x8xf32>
    %24 = arith.subf %23, %15 : vector<8x8xf32>
    %25 = arith.addf %24, %22 : vector<8x8xf32>
    %cst_10 = arith.constant -9.99999995E+11 : f32
    %26 = vector.broadcast %cst_10 : f32 to vector<8x8xf32>
    %27 = arith.mulf %26, %25 : vector<8x8xf32>
    %28 = arith.addf %8, %27 : vector<8x8xf32>
    %29 = arith.index_cast %1 : i32 to index
    %c0_11 = arith.constant 0 : index
    %30 = vector.load %arg18[%29, %c0_11] : memref<8x4xf32, #tpu.memory_space<vmem>>, vector<8x4xf32>
    %c0_12 = arith.constant 0 : index
    %c0_13 = arith.constant 0 : index
    %31 = vector.load %arg17[%c0_12, %c0_13] : memref<4x8xf32, #tpu.memory_space<vmem>>, vector<1x8xf32>
    %32 = vector.broadcast %31 : vector<1x8xf32> to vector<8x8xf32>
    %33 = arith.addf %28, %32 : vector<8x8xf32>
    %34 = vector.extract_strided_slice %30 {offsets = [0, 0], sizes = [8, 1], strides = [1, 1]} : vector<8x4xf32> to vector<8x1xf32>
    %35 = vector.broadcast %34 : vector<8x1xf32> to vector<8x8xf32>
    %36 = arith.addf %33, %35 : vector<8x8xf32>
    %c0_14 = arith.constant 0 : index
    %c0_15 = arith.constant 0 : index
    %c0_16 = arith.constant 0 : index
    %c0_17 = arith.constant 0 : index
    %37 = vector.load %arg14[%c0_14, %c0_15, %c0_16, %c0_17] : memref<1x4x8x8xf32, #tpu.memory_space<vmem>>, vector<1x1x8x8xf32>
    %38 = vector.shape_cast %37 : vector<1x1x8x8xf32> to vector<8x8xf32>
    %39 = vector.shape_cast %36 : vector<8x8xf32> to vector<1x1x8x8xf32>
    tpu.vector_store %arg14[%c0_14, %c0_15, %c0_16, %c0_17], %39 {strides = array<i32>} : memref<1x4x8x8xf32, #tpu.memory_space<vmem>>, vector<1x1x8x8xf32>,
    %c1 = arith.constant 1 : index
    %c0_18 = arith.constant 0 : index
    %40 = vector.load %arg17[%c1, %c0_18] : memref<4x8xf32, #tpu.memory_space<vmem>>, vector<1x8xf32>
    %41 = vector.broadcast %40 : vector<1x8xf32> to vector<8x8xf32>
    %42 = arith.addf %28, %41 : vector<8x8xf32>
    %43 = vector.extract_strided_slice %30 {offsets = [0, 1], sizes = [8, 1], strides = [1, 1]} : vector<8x4xf32> to vector<8x1xf32>
    %44 = vector.broadcast %43 : vector<8x1xf32> to vector<8x8xf32>
    %45 = arith.addf %42, %44 : vector<8x8xf32>
    %c0_19 = arith.constant 0 : index
    %c1_20 = arith.constant 1 : index
    %c0_21 = arith.constant 0 : index
    %c0_22 = arith.constant 0 : index
    %46 = vector.load %arg14[%c0_19, %c1_20, %c0_21, %c0_22] : memref<1x4x8x8xf32, #tpu.memory_space<vmem>>, vector<1x1x8x8xf32>
    %47 = vector.shape_cast %46 : vector<1x1x8x8xf32> to vector<8x8xf32>
    %48 = vector.shape_cast %45 : vector<8x8xf32> to vector<1x1x8x8xf32>
    tpu.vector_store %arg14[%c0_19, %c1_20, %c0_21, %c0_22], %48 {strides = array<i32>} : memref<1x4x8x8xf32, #tpu.memory_space<vmem>>, vector<1x1x8x8xf32>,
    %c2 = arith.constant 2 : index
    %c0_23 = arith.constant 0 : index
    %49 = vector.load %arg17[%c2, %c0_23] : memref<4x8xf32, #tpu.memory_space<vmem>>, vector<1x8xf32>
    %50 = vector.broadcast %49 : vector<1x8xf32> to vector<8x8xf32>
    %51 = arith.addf %28, %50 : vector<8x8xf32>
    %52 = vector.extract_strided_slice %30 {offsets = [0, 2], sizes = [8, 1], strides = [1, 1]} : vector<8x4xf32> to vector<8x1xf32>
    %53 = vector.broadcast %52 : vector<8x1xf32> to vector<8x8xf32>
    %54 = arith.addf %51, %53 : vector<8x8xf32>
    %c0_24 = arith.constant 0 : index
    %c2_25 = arith.constant 2 : index
    %c0_26 = arith.constant 0 : index
    %c0_27 = arith.constant 0 : index
    %55 = vector.load %arg14[%c0_24, %c2_25, %c0_26, %c0_27] : memref<1x4x8x8xf32, #tpu.memory_space<vmem>>, vector<1x1x8x8xf32>
    %56 = vector.shape_cast %55 : vector<1x1x8x8xf32> to vector<8x8xf32>
    %57 = vector.shape_cast %54 : vector<8x8xf32> to vector<1x1x8x8xf32>
    tpu.vector_store %arg14[%c0_24, %c2_25, %c0_26, %c0_27], %57 {strides = array<i32>} : memref<1x4x8x8xf32, #tpu.memory_space<vmem>>, vector<1x1x8x8xf32>,
    %c3 = arith.constant 3 : index
    %c0_28 = arith.constant 0 : index
    %58 = vector.load %arg17[%c3, %c0_28] : memref<4x8xf32, #tpu.memory_space<vmem>>, vector<1x8xf32>
    %59 = vector.broadcast %58 : vector<1x8xf32> to vector<8x8xf32>
    %60 = arith.addf %28, %59 : vector<8x8xf32>
    %61 = vector.extract_strided_slice %30 {offsets = [0, 3], sizes = [8, 1], strides = [1, 1]} : vector<8x4xf32> to vector<8x1xf32>
    %62 = vector.broadcast %61 : vector<8x1xf32> to vector<8x8xf32>
    %63 = arith.addf %60, %62 : vector<8x8xf32>
    %c0_29 = arith.constant 0 : index
    %c3_30 = arith.constant 3 : index
    %c0_31 = arith.constant 0 : index
    %c0_32 = arith.constant 0 : index
    %64 = vector.load %arg14[%c0_29, %c3_30, %c0_31, %c0_32] : memref<1x4x8x8xf32, #tpu.memory_space<vmem>>, vector<1x1x8x8xf32>
    %65 = vector.shape_cast %64 : vector<1x1x8x8xf32> to vector<8x8xf32>
    %66 = vector.shape_cast %63 : vector<8x8xf32> to vector<1x1x8x8xf32>
    tpu.vector_store %arg14[%c0_29, %c3_30, %c0_31, %c0_32], %66 {strides = array<i32>} : memref<1x4x8x8xf32, #tpu.memory_space<vmem>>, vector<1x1x8x8xf32>,
    return
  }
  func.func @transform_0(%arg0: i32, %arg1: i32) -> (i32, i32, i32) {
    %c0_i32 = arith.constant 0 : i32
    %c0_i32_0 = arith.constant 0 : i32
    %c0_i32_1 = arith.constant 0 : i32
    return %arg0, %c0_i32, %c0_i32_0 : i32, i32, i32
  }
  func.func @transform_1(%arg0: i32, %arg1: i32) -> (i32, i32, i32) {
    %c0_i32 = arith.constant 0 : i32
    %c0_i32_0 = arith.constant 0 : i32
    return %arg0, %arg1, %c0_i32 : i32, i32, i32
  }
  func.func @transform_2(%arg0: i32, %arg1: i32) -> (i32, i32, i32) {
    %c0_i32 = arith.constant 0 : i32
    %c0_i32_0 = arith.constant 0 : i32
    %c0_i32_1 = arith.constant 0 : i32
    return %arg0, %c0_i32, %c0_i32_0 : i32, i32, i32
  }
  func.func @transform_3(%arg0: i32, %arg1: i32) -> (i32, i32, i32) {
    %c0_i32 = arith.constant 0 : i32
    %c0_i32_0 = arith.constant 0 : i32
    %c0_i32_1 = arith.constant 0 : i32
    return %arg0, %c0_i32, %c0_i32_0 : i32, i32, i32
  }
  func.func @transform_4(%arg0: i32, %arg1: i32) -> (i32, i32) {
    %c0_i32 = arith.constant 0 : i32
    %c0_i32_0 = arith.constant 0 : i32
    %c0_i32_1 = arith.constant 0 : i32
    return %c0_i32, %c0_i32_0 : i32, i32
  }
  func.func @transform_5(%arg0: i32, %arg1: i32) -> (i32, i32) {
    %c0_i32 = arith.constant 0 : i32
    %c0_i32_0 = arith.constant 0 : i32
    %c0_i32_1 = arith.constant 0 : i32
    return %c0_i32, %c0_i32_0 : i32, i32
  }
  func.func @transform_6(%arg0: i32, %arg1: i32) -> (i32, i32) {
    %c0_i32 = arith.constant 0 : i32
    %c0_i32_0 = arith.constant 0 : i32
    %c0_i32_1 = arith.constant 0 : i32
    return %c0_i32, %c0_i32_0 : i32, i32
  }
  func.func @transform_7(%arg0: i32, %arg1: i32) -> (i32, i32) {
    %c0_i32 = arith.constant 0 : i32
    %c0_i32_0 = arith.constant 0 : i32
    %c0_i32_1 = arith.constant 0 : i32
    return %c0_i32, %c0_i32_0 : i32, i32
  }
  func.func @transform_8(%arg0: i32, %arg1: i32) -> (i32, i32) {
    %c0_i32 = arith.constant 0 : i32
    %c0_i32_0 = arith.constant 0 : i32
    %c0_i32_1 = arith.constant 0 : i32
    return %c0_i32, %c0_i32_0 : i32, i32
  }
  func.func @transform_9(%arg0: i32, %arg1: i32) -> (i32, i32) {
    %c0_i32 = arith.constant 0 : i32
    %c0_i32_0 = arith.constant 0 : i32
    %c0_i32_1 = arith.constant 0 : i32
    return %c0_i32, %c0_i32_0 : i32, i32
  }
  func.func @transform_10(%arg0: i32, %arg1: i32) -> (i32, i32) {
    %c0_i32 = arith.constant 0 : i32
    %c0_i32_0 = arith.constant 0 : i32
    %c0_i32_1 = arith.constant 0 : i32
    return %c0_i32, %c0_i32_0 : i32, i32
  }
  func.func @transform_11(%arg0: i32, %arg1: i32) -> (i32, i32) {
    %c0_i32 = arith.constant 0 : i32
    %c0_i32_0 = arith.constant 0 : i32
    %c0_i32_1 = arith.constant 0 : i32
    return %c0_i32, %c0_i32_0 : i32, i32
  }
  func.func @transform_12(%arg0: i32, %arg1: i32) -> (i32, i32, i32, i32) {
    %c0_i32 = arith.constant 0 : i32
    %c0_i32_0 = arith.constant 0 : i32
    %c0_i32_1 = arith.constant 0 : i32
    return %arg0, %c0_i32, %arg1, %c0_i32_0 : i32, i32, i32, i32
  }
}

</mosaic_0001>

<bundles_post_ra>
// kernel: tpu_custom_call.1
= control target key start
LH: loop header
LB: loop body
LE: loop exit
PB: predicated region body
PF: predicated region fallthrough
CT: control target
= control target key end

     0   :  { %s3149_s0 = inlined_call_operand.vmem [shape: f32[2,8,1], index: 0, kind: input, shape index: {}]   ;;  %s3150_s1 = inlined_call_operand.vmem [shape: f32[2,8,1], index: 1, kind: input, shape index: {}]   ;;  %s3151_s2 = inlined_call_operand.vmem [shape: f32[2,1,8], index: 2, kind: input, shape index: {}]   ;;  %s3152_s3 = inlined_call_operand.vmem [shape: f32[2,8,32], index: 3, kind: input, shape index: {}]   ;;  %s3153_s4 = inlined_call_operand.vmem [shape: f32[32,64], index: 4, kind: input, shape index: {}]   ;;  %s3154_s5 = inlined_call_operand.vmem [shape: f32[1,64], index: 5, kind: input, shape index: {}]   ;;  %s3155_s6 = inlined_call_operand.vmem [shape: f32[4,32], index: 6, kind: input, shape index: {}]   ;;  %s3156_s7 = inlined_call_operand.vmem [shape: f32[4,1], index: 7, kind: input, shape index: {}]   ;;  %s3157_s8 = inlined_call_operand.vmem [shape: f32[32,4], index: 8, kind: input, shape index: {}]   ;;  %s3158_s9 = inlined_call_operand.vmem [shape: f32[1,4], index: 9, kind: input, shape index: {}]   ;;  %s3159_s10 = inlined_call_operand.vmem [shape: f32[8,32], index: 10, kind: input, shape index: {}]   ;;  %s3160_s11 = inlined_call_operand.vmem [shape: f32[8,32], index: 11, kind: input, shape index: {}]   ;;  %s3161_s12 = inlined_call_operand.hbm [shape: f32[2,4,8,8], index: 12, kind: output, shape index: {}]  }
   0x1   :  { %3163 = sst [smem:[#allocation10_spill]] %s3153_s4 }
   0x2   :  { %3164 = sst [smem:[#allocation11_spill]] %s3160_s11 }
   0x3   :  { %17 = vsyncpa [#allocation7], 0 }
   0x4   :  { %19 = vsyncpa [#allocation7 + $0x1], 0  ;;  %s2847_s21 = smov 0   ;;  %s2849_s22 = smov 0  }
   0x5   :  { %s2851_s23 = smov 0   ;;  %s2853_s24 = smov 0  }
   0x6   :  { %s2855_s25 = smov 0   ;;  %s2857_s26 = smov 0  }
   0x7 LB: > { %s2241_s27 = sadd.s32 4294967295, %s2767_s26   ;;  %s2242_s28 = sadd.s32 4294967294, %s2767_s26   ;;  %s2767_s26 = sphi %s2857_s26, %s25_s26   ;;  %s2763_s25 = sphi %s2855_s25, %s3175_s25   ;;  %s2759_s24 = sphi %s2853_s24, %s3174_s24   ;;  %s2755_s23 = sphi %s2851_s23, %s3173_s23   ;;  %s2751_s22 = sphi %s2849_s22, %s3172_s22   ;;  %s2747_s21 = sphi %s2847_s21, %s3171_s21  }
   0x8   : > { %s37_s29 = sadd.s32 1, %s2763_s25  ;;  %s320_s30 = sadd.s32 1, %s2755_s23 }
   0x9   : > { %p39_p0 = scmp.ge.s32.totalorder %s37_s29, 2  ;;  %p330_p1 = scmp.ne.s32.totalorder %s2755_s23, %s2751_s22 }
   0xa   : > { %p331_p2 = scmp.eq.s32.totalorder %s2241_s27, 1  ;;  %p336_p3 = scmp.ne.s32.totalorder %s2751_s22, %s2747_s21 }
   0xb   : > { %s3177_s29 = smov (%p39_p0, %s37_s29), 0  ;;  %p337_p5 = scmp.eq.s32.totalorder %s2242_s28, 1 }
   0xc   : > { %3165 = sst [smem:[#allocation9_spill]] %s3177_s29  ;;  %p2887_p4 = por %p331_p2, %p330_p1 }
   0xd   : > { %s315_s14 = ssub.s32 %s2763_s25, %s3177_s29  ;;  %p2245_p6 = scmp.ge.s32.totalorder %s2767_s26, 1 }
   0xe   : > { %p318_p7 = scmp.eq.s32.totalorder %s315_s14, 0  ;;  %p2894_p8 = por %p337_p5, %p336_p3 }
   0xf   : > { %p409_p9 = scmp.lt.s32.totalorder %s2767_s26, 3 }
  0x10   : > { %s2900_s16 = scalar_select %p318_p7, %s2755_s23, %s320_s30  }
  0x11   : > { %p410_p10 = pnand %p2245_p6, %p409_p9 }
  0x12   : > { %s3168_s4 = sld [smem:[#allocation10_spill]] (!%p410_p10)  ;;  %v2769_v3 = vmov (!%p410_p10), 0.0|0.0   ;;  %vm2770_vm0 = vmmov (!%p410_p10), 0   ;;  %v2771_v8 = vmov (!%p410_p10), 0.0   ;;  %p464_p11 = scmp.lt.s32.totalorder (!%p410_p10), %s2759_s24, 1  ;;  %v2773_v16 = vmov (!%p410_p10), 0  }
  0x13   : > { %413 = sbr.rel (%p410_p10) target bundleno = 784 (0x310), region = 68  ;;  %2512 = vmatprep.subr.bf16.mxu0 (!%p410_p10), %v2769_v3  ;;  %2352 = vmatprep.mubr.msk.f32.mxu0 (!%p410_p10), %vm2770_vm0, %v2771_v8  ;;  %s3169_s11 = sld [smem:[#allocation11_spill]] (!%p410_p10)  ;;  %vm500_vm1 = vcmask (!%p410_p10), 261120   ;;  %v1019_v45 = vld [vmem:[%s3155_s6] sm:$0xf] (!%p410_p10)  ;;  %vm1010_vm2 = vcmask (!%p410_p10), 125952  }
  0x14   : > { %2415 = vmatprep.subr.mxu1 (!%p410_p10), %v2771_v8  ;;  %2417 = vmatprep.mubr.msk.f32.mxu1 (!%p410_p10), %vm2770_vm0, %v2771_v8  ;;  %s2772_s20 = smov (!%p410_p10), 32   ;;  %v1027_v46 = vsel (!%p410_p10), %vm500_vm1, %v1019_v45, 0  ;;  %v2250_v49 = vld [vmem:[%s3154_s5] ss:$0 sm:$0xff] (!%p410_p10)  ;;  %s2774_s28 = smov (!%p410_p10), 96   ;;  %vm2012_vm3 = vcmask (!%p410_p10), 130048  }
  0x15   : > { %2683 = vset.pattern.permute.xlu0 (!%p410_p10), %v2773_v16  ;;  %2684 = vset.pattern.permute.xlu1 (!%p410_p10), %v2773_v16  ;;  %v1098_v47 = vand.u32 (!%p410_p10), 4294901760, %v1027_v46  ;;  %s2775_s30 = smov (!%p410_p10), 112   ;;  %vm1479_vm4 = vcmask (!%p410_p10), 60416   ;;  %vm1978_vm5 = vcmask (!%p410_p10), 31744   ;;  %vm2073_vm7 = vcmask (!%p410_p10), 64512  }
  0x17   : > { %v1099_v48 = vsub.f32 (!%p410_p10), %v1027_v46, %v1098_v47 }
  0x18   : > { %v489_v0 = vld [vmem:[%s3168_s4] sm:$0xff] (!%p410_p10)  ;;  %v490_v1 = vld [vmem:[%s3168_s4 + $0x8] sm:$0xff] (!%p410_p10)  ;;  %v491_v2 = vld [vmem:[%s3168_s4 + $0x10] sm:$0xff] (!%p410_p10) }
  0x19   : > { %v505_v4 = vand.u32 (!%p410_p10), 4294901760, %v489_v0  ;;  %v508_v5 = vand.u32 (!%p410_p10), 4294901760, %v490_v1  ;;  %v492_v6 = vld [vmem:[%s3168_s4 + $0x18] sm:$0xff] (!%p410_p10)  ;;  %v511_v7 = vand.u32 (!%p410_p10), 4294901760, %v491_v2  ;;  %v991_v10 = vld [vmem:[%s3169_s11] sm:$0xff] (!%p410_p10)  ;;  %v1100_v50 = vand.u32 (!%p410_p10), 4294901760, %v1099_v48 }
  0x1a   : > { %v514_v9 = vand.u32 4294901760, %v492_v6  ;;  %s2933_s19 = scalar_select %p464_p11, %s2759_s24, 1  ;;  %993 = vrot.lane.b32.xlu0 %v991_v10, %s2772_s20 }
  0x1b   : > { %v2924_v11 = vpack.c.bf16 %v508_v5, %v505_v4  ;;  %v2926_v12 = vsub.f32 %v489_v0, %v505_v4  ;;  %v2928_v13 = vsub.f32 %v490_v1, %v508_v5  ;;  %v2930_v14 = vsub.f32 %v491_v2, %v511_v7  ;;  %v1481_v0 = vld [vmem:[%s3157_s8] sm:$0xff]  ;;  %v1482_v1 = vld [vmem:[%s3157_s8 + $0x8] sm:$0xff]  ;;  %v1483_v5 = vld [vmem:[%s3157_s8 + $0x10] sm:$0xff]  ;;  %s2779_s11 = smov [#allocation6]  }
  0x1c   : > { %v2935_v15 = vsub.f32 %v492_v6, %v514_v9  ;;  %v2938_v17 = vpack.c.bf16 %v514_v9, %v511_v7  ;;  %s2247_s27 = sshll.u32 %s2933_s19, 3  ;;  %v1101_v55 = vsub.f32 %v1099_v48, %v1100_v50  ;;  %v1493_v2 = vand.u32 4294901760, %v1481_v0  ;;  %v1484_v6 = vld [vmem:[%s3157_s8 + $0x18] sm:$0xff] }
  0x1d   : > { %2514 = vmatpush3.bf16.msra.mxu0 %v2924_v11  ;;  %v586_v18 = vand.u32 4294901760, %v2926_v12  ;;  %v593_v19 = vand.u32 4294901760, %v2928_v13  ;;  %s481_s14 = scalar_lea.vmem %s3152_s3, %s2247_s27  ;;  %s467_s20 = scalar_lea.vmem %s3149_s0, %s2247_s27  ;;  %v600_v21 = vand.u32 4294901760, %v2930_v14  ;;  %v2525_v41 = vpack.c.bf16 %v2928_v13, %v2926_v12 }
  0x1e   : > { %2515 = vmatprep.subr.bf16.mxu0 %v2769_v3  ;;  %v488_v20 = vld [vmem:[%s481_s14] sm:$0xff]  ;;  %s474_s29 = scalar_lea.vmem %s3150_s1, %s2247_s27  ;;  %v607_v26 = vand.u32 4294901760, %v2935_v15  ;;  %v2528_v42 = vpack.c.bf16 %v2935_v15, %v2930_v14  ;;  %v1102_v59 = vand.u32 4294901760, %v1101_v55  ;;  %v1496_v4 = vand.u32 4294901760, %v1482_v1  ;;  %s461_s27 = sand.u32 1, %s2751_s22  }
  0x1f   : > { %v1002_v22 = vld [vmem:[%s467_s20] sm:$0xff]  ;;  %v502_v23 = vsel %vm500_vm1, %v488_v20, 0  ;;  %v587_v24 = vsub.f32 %v2926_v12, %v586_v18  ;;  %v594_v25 = vsub.f32 %v2928_v13, %v593_v19  ;;  %v601_v32 = vsub.f32 %v2930_v14, %v600_v21 }
  0x20   : > { %1005 = vperm.xlu0 %2683, %v1002_v22   ;;  %v573_v27 = vand.u32 4294901760, %v502_v23  ;;  %v1986_v28 = vld [vmem:[%s474_s29] sm:$0xff]  ;;  %v608_v33 = vsub.f32 %v2935_v15, %v607_v26  ;;  %v2537_v43 = vpack.c.bf16 %v593_v19, %v586_v18  ;;  %v2540_v44 = vpack.c.bf16 %v607_v26, %v600_v21  ;;  %s477_s29 = scalar_lea.vmem %s3151_s2, %s2933_s19  ;;  %s2269_s19 = sshll.u32 %s2759_s24, 9 }
  0x21   : > { %2517 = vmatpush3.bf16.msra.mxu0 %v2938_v17  ;;  %v588_v30 = vand.u32 4294901760, %v587_v24  ;;  %v595_v31 = vand.u32 4294901760, %v594_v25  ;;  %v602_v37 = vand.u32 4294901760, %v601_v32  ;;  %v1573_v7 = vsub.f32 %v1481_v0, %v1493_v2  ;;  %s3097_s20 = scalar_lea.hbm %s3161_s12, %s2269_s19  ;;  %s3103_s24 = scalar_lea.sflag [#allocation7], %s461_s27 }
  0x22   : > { %2518 = vmatprep.subr.bf16.mxu0 %v2769_v3  ;;  %v574_v29 = vsub.f32 %v502_v23, %v573_v27  ;;  %v609_v38 = vand.u32 4294901760, %v608_v33  ;;  %v1580_v9 = vsub.f32 %v1482_v1, %v1496_v4  ;;  %v1499_v10 = vand.u32 4294901760, %v1483_v5 }
  0x23   : > { %v2519_v36 = vpack.c.bf16 %v595_v31, %v588_v30  ;;  %v1574_v14 = vand.u32 4294901760, %v1573_v7  ;;  %v2549_v16 = vpack.c.bf16 %v1496_v4, %v1493_v2 }
  0x24   : > { %1990 = vperm.xlu0 %2683, %v1986_v28   ;;  %v575_v34 = vand.u32 4294901760, %v574_v29  ;;  %v2522_v40 = vpack.c.bf16 %v609_v38, %v602_v37  ;;  %v1587_v12 = vsub.f32 %v1483_v5, %v1499_v10  ;;  %v1581_v15 = vand.u32 4294901760, %v1580_v9 }
  0x25   : > { %v2561_v30 = vpack.c.bf16 %v1580_v9, %v1573_v7 }
  0x26   : > { %v576_v35 = vsub.f32 %v574_v29, %v575_v34  ;;  %v1582_v18 = vsub.f32 %v1580_v9, %v1581_v15  ;;  %v1588_v19 = vand.u32 4294901760, %v1587_v12  ;;  %v2573_v32 = vpack.c.bf16 %v1581_v15, %v1574_v14 }
  0x28   : > { %v577_v39 = vand.u32 4294901760, %v576_v35  ;;  %v1583_v23 = vand.u32 4294901760, %v1582_v18  ;;  %v1589_v24 = vsub.f32 %v1587_v12, %v1588_v19 }
  0x2a   : > { %2353 = vmatmul.mubr.f32.vlgmr.msra.gmra.mrb[0].mxu0 %v577_v39 }
  0x2b   : > { %2520 = vmatpush3.bf16.msra.mxu0 %v2519_v36  ;;  %2363 = vmatprep.mubr.msk.f32.mxu0 %vm2770_vm0, %v2771_v8 }
  0x2c   : > { %2521 = vmatprep.subr.bf16.mxu0 %v2769_v3 }
  0x2f   : > { %2523 = vmatpush3.bf16.msra.mxu0 %v2522_v40 }
  0x30   : > { %2524 = vmatprep.subr.bf16.mxu0 %v2769_v3 }
  0x32   : > { %2364 = vmatmul.mubr.f32.vlgmr.msra.gmra.mrb[0].mxu0 %v573_v27 }
  0x33   : > { %2526 = vmatpush3.bf16.msra.mxu0 %v2525_v41  ;;  %2374 = vmatprep.mubr.msk.f32.mxu0 %vm2770_vm0, %v2771_v8  ;;  %v2776_v41 = vmov 1  }
  0x34   : > { %2527 = vmatprep.subr.bf16.mxu0 %v2769_v3  ;;  %2685 = vset.pattern.permute.xlu0 %v2776_v41 }
  0x37   : > { %2529 = vmatpush3.bf16.msra.mxu0 %v2528_v42 }
  0x38   : > { %2530 = vmatprep.subr.bf16.mxu0 %v2769_v3 }
  0x3a   : > { %2375 = vmatmul.mubr.f32.vlgmr.msra.gmra.mrb[0].mxu0 %v574_v29 }
  0x3b   : > { %2532 = vmatpush3.bf16.msra.mxu0 %v2924_v11  ;;  %2385 = vmatprep.mubr.msk.f32.mxu0 %vm2770_vm0, %v2771_v8 }
  0x3c   : > { %2533 = vmatprep.subr.bf16.mxu0 %v2769_v3 }
  0x3f   : > { %2535 = vmatpush3.bf16.msra.mxu0 %v2938_v17 }
  0x40   : > { %2536 = vmatprep.subr.bf16.mxu0 %v2769_v3 }
  0x42   : > { %2386 = vmatmul.mubr.f32.vlgmr.msra.gmra.mrb[0].mxu0 %v575_v34  ;;  %v989_v34 = vld [vmem:[%s3159_s10] sm:$0xff] }
  0x43   : > { %2538 = vmatpush3.bf16.msra.mxu0 %v2537_v43  ;;  %2396 = vmatprep.mubr.msk.f32.mxu0 %vm2770_vm0, %v2771_v8 }
  0x44   : > { %2539 = vmatprep.subr.bf16.mxu0 %v2769_v3 }
  0x47   : > { %2541 = vmatpush3.bf16.msra.mxu0 %v2540_v44 }
  0x48   : > { %2542 = vmatprep.subr.bf16.mxu0 %v2769_v3 }
  0x4a   : > { %2397 = vmatmul.mubr.f32.vlgmr.msra.gmra.mrb[0].mxu0 %v573_v27 }
  0x4b   : > { %2544 = vmatpush3.bf16.msra.mxu0 %v2924_v11  ;;  %2407 = vmatprep.mubr.msk.f32.mxu0 %vm2770_vm0, %v2771_v8  ;;  %v1502_v11 = vand.u32 4294901760, %v1484_v6 }
  0x4c   : > { %2545 = vmatprep.subr.bf16.mxu0 %v2769_v3 }
  0x4d   : > { %v1594_v13 = vsub.f32 %v1484_v6, %v1502_v11  ;;  %v2552_v21 = vpack.c.bf16 %v1502_v11, %v1499_v10 }
  0x4f   : > { %2547 = vmatpush3.bf16.msra.mxu0 %v2938_v17  ;;  %v1575_v17 = vsub.f32 %v1573_v7, %v1574_v14  ;;  %v1595_v20 = vand.u32 4294901760, %v1594_v13  ;;  %v2564_v31 = vpack.c.bf16 %v1594_v13, %v1587_v12 }
  0x50   : > { %2410 = vmatprep.subr.mxu0 %v2771_v8 }
  0x51   : > { %v1576_v22 = vand.u32 4294901760, %v1575_v17  ;;  %v1596_v25 = vsub.f32 %v1594_v13, %v1595_v20  ;;  %v2576_v33 = vpack.c.bf16 %v1595_v20, %v1588_v19 }
  0x52   : > { %2408 = vmatmul.mubr.f32.vlgmr.msra.gmra.mrb[0].mxu0 %v573_v27  ;;  %v1590_v27 = vand.u32 4294901760, %v1589_v24 }
  0x53   : > { %2412 = vmatprep.mubr.msk.f32.mxu0 %vm2770_vm0, %v2771_v8  ;;  %v2555_v26 = vpack.c.bf16 %v1583_v23, %v1576_v22  ;;  %v1597_v28 = vand.u32 4294901760, %v1596_v25 }
  0x55   : > { %v2558_v29 = vpack.c.bf16 %v1597_v28, %v1590_v27 }
  0x8c   : > { %v994_v52 = vpop.permute.xlu0 %993 }
  0x9f   : > { %v1006_v38 = vpop.permute.xlu0 %1005 }
  0xa3   : > { %v1991_v0 = vpop.permute.xlu0 %1990 }
 0x125   : > { %v985_v51 = vpop.f32.mrb[0].mxu0 }
 0x126   : > { %v2999_v53 = vadd.f32 %v2250_v49, %v985_v51  ;;  %v2409_v54 = vpop.f32.mrb[1].mxu0 }
 0x127   : > { %v2252_v54 = vld [vmem:[%s3158_s9] ss:$0 sm:$0xff] }
 0x128   : > { %v1030_v56 = vsel %vm500_vm1, %v2999_v53, 0  ;;  %v996_v57 = vmul.f32 %v2999_v53, %v994_v52  ;;  %v990_v35 = vmul.f32 %v2999_v53, %v989_v34 }
 0x129   : > { %v3004_v58 = vand.u32 4294901760, %v1030_v56 }
 0x12a   : > { %998 = vrot.lane.b32.xlu1 %v996_v57, %s2774_s28  ;;  %s2246_s28 = sshll.u32 %s461_s27, 5 }
 0x12b   : > { %v3007_v60 = vsub.f32 %v1030_v56, %v3004_v58  ;;  %2411 = vmatpush3.xpose.msra.mxu0 %v3004_v58 }
 0x12c   : > { %2506 = vmatprep.subr.bf16.mxu0 %v2771_v8 }
 0x12d   : > { %v3012_v61 = vand.u32 4294901760, %v3007_v60 }
 0x12e   : > { %2413 = vmatmul.mubr.f32.vlgmr.msra.gmra.mrb[2].mxu0 %v1102_v59 }
 0x12f   : > { %v1112_v62 = vsub.f32 %v3007_v60, %v3012_v61  ;;  %2508 = vmatprep.mubr.msk.bf16.mxu0 %vm2770_vm0, %v2771_v8 }
 0x131   : > { %v1113_v63 = vand.u32 4294901760, %v1112_v62  ;;  %v2000_v62 = vlaneseq }
 0x133   : > { %2416 = vmatpush3.xpose.msra.mxu1 %v1113_v63  ;;  %v2001_v1 = vshrl.u32 %v2000_v62, 7  ;;  %v2005_v2 = vand.u32 127, %v2000_v62 }
 0x134   : > { %2420 = vmatprep.subr.mxu1 %v2771_v8 }
 0x135   : > { %vm2006_vm6 = vcmp.gt.s32.totalorder %v2001_v1, %v2005_v2 }
 0x136   : > { %2418 = vmatmul.mubr.f32.vlgmr.msra.gmra.mrb[0].mxu1 %v1098_v47  ;;  %v2254_v7 = vsel %vm2006_vm6, 1.0, %v2771_v8 }
 0x137   : > { %2421 = vmatpush3.xpose.msra.mxu1 %v3007_v60  ;;  %2422 = vmatprep.mubr.msk.f32.mxu1 %vm2770_vm0, %v2771_v8 }
 0x138   : > { %2425 = vmatprep.subr.mxu1 %v2771_v8 }
 0x13e   : > { %2423 = vmatmul.mubr.f32.vlgmr.msra.gmra.mrb[0].mxu1 %v1099_v48 }
 0x13f   : > { %2426 = vmatpush3.xpose.msra.mxu1 %v3004_v58  ;;  %2427 = vmatprep.mubr.msk.f32.mxu1 %vm2770_vm0, %v2771_v8 }
 0x140   : > { %2430 = vmatprep.subr.mxu1 %v2771_v8 }
 0x146   : > { %2428 = vmatmul.mubr.f32.vlgmr.msra.gmra.mrb[0].mxu1 %v1100_v50 }
 0x147   : > { %2431 = vmatpush3.xpose.msra.mxu1 %v3012_v61  ;;  %2432 = vmatprep.mubr.msk.f32.mxu1 %vm2770_vm0, %v2771_v8 }
 0x148   : > { %2435 = vmatprep.subr.mxu1 %v2771_v8 }
 0x14e   : > { %2433 = vmatmul.mubr.f32.vlgmr.msra.gmra.mrb[0].mxu1 %v1098_v47 }
 0x14f   : > { %2436 = vmatpush3.xpose.msra.mxu1 %v3004_v58  ;;  %2437 = vmatprep.mubr.msk.f32.mxu1 %vm2770_vm0, %v2771_v8 }
 0x150   : > { %2548 = vmatprep.subr.bf16.mxu1 %v2769_v3 }
 0x156   : > { %2438 = vmatmul.mubr.f32.vlgmr.msra.gmra.mrb[0].mxu1 %v1098_v47 }
 0x157   : > { %2550 = vmatpush3.bf16.msra.mxu1 %v2549_v16  ;;  %2448 = vmatprep.mubr.msk.f32.mxu1 %vm2770_vm0, %v2771_v8 }
 0x158   : > { %2551 = vmatprep.subr.bf16.mxu1 %v2769_v3 }
 0x15b   : > { %2553 = vmatpush3.bf16.msra.mxu1 %v2552_v21 }
 0x15c   : > { %2554 = vmatprep.subr.bf16.mxu1 %v2769_v3 }
 0x15e   : > { %2449 = vmatmul.mubr.f32.vlgmr.msra.gmra.mrb[2].mxu1 %v1113_v63  ;;  %v2253_v63 = vld [vmem:[%s477_s29] ss:$0 sm:$0xff]  ;;  %s2693_s29 = sshll.u32 %s2779_s11, 4  ;;  %s2694_s29 = int_to_ptr.vmem [resolvable:$false] %s2693_s29 }
 0x15f   : > { %2556 = vmatpush3.bf16.msra.mxu1 %v2555_v26  ;;  %2459 = vmatprep.mubr.msk.f32.mxu1 %vm2770_vm0, %v2771_v8  ;;  %v1999_v4 = vmul.f32 %v2253_v63, %v1991_v0 }
 0x160   : > { %2557 = vmatprep.subr.bf16.mxu1 %v2769_v3 }
 0x161   : > { %v2009_v5 = vsub.f32 1.0, %v1999_v4 }
 0x163   : > { %2559 = vmatpush3.bf16.msra.mxu1 %v2558_v29  ;;  %v2010_v9 = vadd.f32 %v2254_v7, %v2009_v5 }
 0x164   : > { %2560 = vmatprep.subr.bf16.mxu1 %v2769_v3 }
 0x165   : > { %v2011_v11 = vmul.f32 -1e+12, %v2010_v9 }
 0x166   : > { %2460 = vmatmul.mubr.f32.vlgmr.msra.gmra.mrb[2].mxu1 %v3004_v58 }
 0x167   : > { %2562 = vmatpush3.bf16.msra.mxu1 %v2561_v30  ;;  %2470 = vmatprep.mubr.msk.f32.mxu1 %vm2770_vm0, %v2771_v8 }
 0x168   : > { %2563 = vmatprep.subr.bf16.mxu1 %v2769_v3 }
 0x16b   : > { %2565 = vmatpush3.bf16.msra.mxu1 %v2564_v31 }
 0x16c   : > { %2566 = vmatprep.subr.bf16.mxu1 %v2769_v3 }
 0x16e   : > { %2471 = vmatmul.mubr.f32.vlgmr.msra.gmra.mrb[2].mxu1 %v3007_v60  ;;  %v2777_v60 = vmov 2  }
 0x16f   : > { %2568 = vmatpush3.bf16.msra.mxu1 %v2549_v16  ;;  %2481 = vmatprep.mubr.msk.f32.mxu1 %vm2770_vm0, %v2771_v8 }
 0x170   : > { %2569 = vmatprep.subr.bf16.mxu1 %v2769_v3 }
 0x173   : > { %2571 = vmatpush3.bf16.msra.mxu1 %v2552_v21 }
 0x174   : > { %2572 = vmatprep.subr.bf16.mxu1 %v2769_v3 }
 0x176   : > { %2482 = vmatmul.mubr.f32.vlgmr.msra.gmra.mrb[2].mxu1 %v3012_v61  ;;  %v2778_v61 = vmov 3  }
 0x177   : > { %2574 = vmatpush3.bf16.msra.mxu1 %v2573_v32  ;;  %2492 = vmatprep.mubr.msk.f32.mxu1 %vm2770_vm0, %v2771_v8 }
 0x178   : > { %2575 = vmatprep.subr.bf16.mxu1 %v2769_v3 }
 0x17b   : > { %2577 = vmatpush3.bf16.msra.mxu1 %v2576_v33 }
 0x17c   : > { %2578 = vmatprep.subr.bf16.mxu1 %v2769_v3 }
 0x17e   : > { %2493 = vmatmul.mubr.f32.vlgmr.msra.gmra.mrb[2].mxu1 %v3004_v58 }
 0x17f   : > { %2580 = vmatpush3.bf16.msra.mxu1 %v2549_v16  ;;  %2503 = vmatprep.mubr.msk.f32.mxu1 %vm2770_vm0, %v2771_v8 }
 0x180   : > { %2581 = vmatprep.subr.bf16.mxu1 %v2769_v3  ;;  %v1020_v3 = vld [vmem:[%s3156_s7] sm:$0xf] }
 0x183   : > { %2583 = vmatpush3.bf16.msra.mxu1 %v2552_v21 }
 0x186   : > { %2504 = vmatmul.mubr.f32.vlgmr.msra.gmra.mrb[2].mxu1 %v3004_v58 }
 0x19c   : > { %v999_v36 = vpop.permute.xlu1 %998 }
 0x19d   : > { %v1001_v37 = vadd.f32 %v999_v36, %v990_v35 }
 0x19f   : > { %v1008_v39 = vmul.f32 %v1006_v38, %v1001_v37 }
 0x1a1   : > { %v1009_v40 = vpack.c.bf16 %v1008_v39, %v1008_v39 }
 0x1a3   : > { %1015 = vrot.lane.b32.xlu1 %v1009_v40, %s2775_s30  ;;  %1011 = vst.msk [vmem:[#allocation2] sm:$0xf] %vm1010_vm2, %v1009_v40  ;;  %s463_s30 = scalar_lea.vmem [#allocation6], %s2246_s28  ;;  %s2695_s28 = scalar_lea.vmem %s2694_s29, 1024 }
 0x1a4   : > { %s2129_s14 = sshll.u32 %s463_s30, 4  ;;  %s3099_s14 = int_to_ptr.vmem [resolvable:$true] %s2129_s14 }
 0x1a5   : > { %s2689_s4 = scalar_lea.vmem %s3099_s14, 512  ;;  %p2696_p1 = scmp.lt.s32.totalorder %s3099_s14, %s2694_s29 }
 0x1a6   : > { %p2690_p12 = scmp.ne.s32.totalorder %s3099_s14, %s2689_s4  ;;  %p2697_p2 = scmp.lt.s32.totalorder %s2695_s28, %s2689_s4 }
 0x1a7   : > { %1023 = vperm.xlu1 %2684, %v1020_v3  }
 0x1a8   : > { %p2691_p13 = pnand %p2690_p12, %p2887_p4  ;;  %p2698_p3 = por %p2697_p2, %p2696_p1 }
 0x1aa   : > { %v1984_v47 = vld [vmem:[#allocation2] sm:$0xf]  ;;  %p2692_p0 = pneg %p2691_p13 }
 0x1ac   : > { %p2699_p5 = pnand %p2698_p3, %p2692_p0 }
 0x201   : > { %v1104_v42 = vpop.f32.mrb[2].mxu0 }
 0x202   : > { %v2414_v43 = vpop.f32.mrb[3].mxu0 }
 0x215   : > { %v1016_v44 = vpop.permute.xlu1 %1015 }
 0x216   : > { %1018 = vst.msk [vmem:[#allocation3] sm:$0xf] %vm1010_vm2, %v1016_v44 }
 0x21d   : > { %v1985_v45 = vld [vmem:[#allocation3] sm:$0xf] }
 0x21e   : > { %v2017_v46 = vsel %vm2012_vm3, %v1985_v45, 0 }
 0x21f   : > { %2507 = vmatpush3.bf16.xpose.msra.mxu0 %v2017_v46 }
 0x226   : > { %2509 = vmatmul.mubr.msk.bf16.vlgmr.msra.gmra.mrb[4].mxu0 %vm2012_vm3, %v1984_v47  ;;  %v1024_v48 = vpop.permute.xlu1 %1023 }
 0x227   : > { %v1105_v49 = vadd.f32 %v1104_v42, %v1024_v48 }
 0x229   : > { %v1474_v50 = vpop.f32.mrb[0].mxu1 }
 0x22a   : > { %v2586_v51 = vadd.f32 %v1474_v50, %v1105_v49  ;;  %v2439_v52 = vpop.f32.mrb[1].mxu1 }
 0x22c   : > { %v1478_v53 = vmul.f32 0.5, %v2586_v51 }
 0x22e   : > { %1480 = vst.msk [vmem:[#allocation4] sm:$0xf] %vm1479_vm4, %v1478_v53 }
 0x235   : > { %v2256_v13 = vld [vmem:[#allocation4] ss:$0 sm:$0xff]  ;;  %v2257_v15 = vld [vmem:[#allocation4 + $0x1] ss:$0 sm:$0xff]  ;;  %v2259_v17 = vld [vmem:[#allocation4 + $0x2] ss:$0 sm:$0xff] }
 0x236   : > { %v2261_v18 = vld [vmem:[#allocation4 + $0x3] ss:$0 sm:$0xff] }
 0x259   : > { %v1973_v55 = vpop.f32.mrb[2].mxu1 }
 0x25a   : > { %v2587_v56 = vadd.f32 %v2252_v54, %v1973_v55  ;;  %v2505_v57 = vpop.f32.mrb[3].mxu1 }
 0x25c   : > { %v1977_v58 = vmul.f32 0.5, %v2587_v56 }
 0x25e   : > { %1979 = vst.msk [vmem:[#allocation5] sm:$0xff] %vm1978_vm5, %v1977_v58 }
 0x265   : > { %v2060_v59 = vld [vmem:[#allocation5] sm:$0xff] }
 0x266   : > { %2082 = vperm.xlu0 %2685, %v2060_v59   ;;  %2069 = vperm.xlu1 %2684, %v2060_v59  }
 0x26a   : > { %2686 = vset.pattern.permute.xlu1 %v2777_v60  ;;  %2688 = vset.pattern.permute.xlu0 %v2778_v61 }
 0x26b   : > { %2095 = vperm.xlu1 %2686, %v2060_v59  }
 0x26f   : > { %2687 = vset.pattern.permute.xlu1 %v2778_v61 }
 0x270   : > { %2108 = vperm.xlu1 %2687, %v2060_v59  }
 0x2e5   : > { %v2070_v6 = vpop.permute.xlu1 %2069  ;;  %v2083_v24 = vpop.permute.xlu0 %2082 }
 0x2ea   : > { %v2096_v10 = vpop.permute.xlu1 %2095 }
 0x2ef   : > { %v2109_v25 = vpop.permute.xlu1 %2108 }
 0x2f9   : > { %v2053_v12 = vpop.f32.mrb[4].mxu0 }
 0x2fa   : > { %v2054_v14 = vadd.f32 %v2053_v12, %v2011_v11  ;;  %v2510_v16 = vpop.f32.mrb[5].mxu0 }
 0x2fb   : > { %v2056_v19 = vpop.f32.mrb[6].mxu0 }
 0x2fc   : > { %v2066_v20 = vadd.f32 %v2256_v13, %v2054_v14  ;;  %v2080_v21 = vadd.f32 %v2257_v15, %v2054_v14  ;;  %v2093_v22 = vadd.f32 %v2259_v17, %v2054_v14  ;;  %v2106_v8 = vadd.f32 %v2261_v18, %v2054_v14  ;;  %v2511_v23 = vpop.f32.mrb[7].mxu0 }
 0x2fe   : > { %v2072_v26 = vadd.f32 %v2070_v6, %v2066_v20  ;;  %v2085_v27 = vadd.f32 %v2083_v24, %v2080_v21  ;;  %v2098_v28 = vadd.f32 %v2096_v10, %v2093_v22  ;;  %v2111_v29 = vadd.f32 %v2109_v25, %v2106_v8 }
 0x300   : > { %2074 = vst.msk [vmem:[%s463_s30] sm:$0xff] %vm2073_vm7, %v2072_v26  ;;  %2258 = vst.msk [vmem:[%s463_s30 + $0x8] sm:$0xff] %vm2073_vm7, %v2085_v27 }
 0x301   : > { %2260 = vst.msk [vmem:[%s463_s30 + $0x10] sm:$0xff] %vm2073_vm7, %v2098_v28  ;;  %2262 = vst.msk [vmem:[%s463_s30 + $0x18] sm:$0xff] %vm2073_vm7, %v2111_v29 }
 0x302   : > { %2702 = shalt.err (!%p2699_p5)
}
 0x303   : > { %s2703_s27 = scalar_lea.hbm %s3097_s20, 512  ;;  %s2707_s17 = scalar_lea.hbm %s3161_s12, 1024 }
 0x304   : > { %p2704_p6 = scmp.ne.s32.totalorder %s3097_s20, %s2703_s27  ;;  %p2708_p10 = scmp.lt.u32.totalorder %s3097_s20, %s3161_s12 }
 0x305   : > { %p2709_p11 = scmp.lt.u32.totalorder %s2707_s17, %s2703_s27  ;;  %p2711_p13 = scmp.lt.u32.totalorder %s2703_s27, %s3097_s20 }
 0x306   : > { %p2705_p7 = pnand %p2704_p6, %p2887_p4 }
 0x307   : > { %p2710_p12 = por %p2709_p11, %p2708_p10 }
 0x308   : > { %p2706_p9 = pneg %p2705_p7 }
 0x309   : > { %p2712_p0 = por %p2711_p13, %p2710_p12 }
 0x30b   : > { %p2713_p1 = pnand %p2712_p0, %p2706_p9 }
 0x30d   : > { %2716 = shalt.err (!%p2713_p1)
}
 0x30e   : > { %s2780_s4 = smov 128   ;;  %s2781_s29 = smov 8  }
 0x30f   : > { %2616 = dma.vmem_to_hbm [thread:$0]  (%p2887_p4), %s3099_s14, 512, %s3097_s20, %s3103_s24, %s2780_s4, %s2780_s4, %s2781_s29  }
 0x310 PF: > { %p2622_p2 = scmp.ge.s32.totalorder %s2767_s26, 2  ;;  %s2144_s28 = sand.u32 1, %s2747_s21  }
 0x311   : > { %s2145_s27 = scalar_lea.sflag [#allocation7], %s2144_s28 }
 0x312   : > { %p2619_p3 = pnand %p2622_p2, %p2894_p8 }
 0x314   : > { %2742 = dma.done.wait (!%p2619_p3), %s2145_s27, 512  }
 0x315   : > { %2744 = vsyncadd (!%p2619_p3), %s2145_s27, 4294966784  ;;  %s25_s26 = sadd.s32 1, %s2767_s26   ;;  %s3170_s13 = sld [smem:[#allocation9_spill]] }
 0x316   : > { %p22_p5 = scmp.ge.s32.totalorder %s25_s26, 4   ;;  %s3171_s21 = smov %s2751_s22 }
 0x317   : > { %s3172_s22 = smov %s2755_s23  ;;  %s3173_s23 = smov %s2900_s16 }
 0x318   : > { %s3174_s24 = smov %s2763_s25  ;;  %24 = sbr.rel (!%p22_p5) target bundleno = 7 (0x7), region = 121 }
 0x31b   : > { %s3175_s25 = smov %s3170_s13 }
 0x31f   :  { %2150 = vsyncpa [#allocation7], 1 }
 0x320   :  { %2152 = vsyncpa [#allocation7 + $0x1], 1 }

</bundles_post_ra>
